<compile_context>
chip_gen: v6e
topology: v6e:2x2x1
jax: 0.10.0
libtpu: 0.0.40
codegen_flags: <defaults>
</compile_context>

<pallas_src>
import functools

import jax
import jax.numpy as jnp
import numpy as np
from jax.experimental import pallas as pl
from jax.experimental.pallas import tpu as pltpu


# ----------------------------------------------------------------------------
# Load-time weight packing (host-side numpy, done once).
# ----------------------------------------------------------------------------
def _pack_conv_s2(w_khwc, b, width):
    """Conv2d(cin->cout, 3x3, stride=2, pad=1) as a single banded GEMM.

    The kernel feeds a band whose row m is the lane-concat of input rows
    2m-1, 2m, 2m+1 (zero out of range), each in (col*cin + ci) lane layout.
    W-direction taps, stride-2 subsampling and W zero-padding are folded here.

    Returns mat (3*width*cin, (width//2)*cout), brow (1, (width//2)*cout).
    """
    w = np.asarray(w_khwc, np.float32)
    b = np.asarray(b, np.float32)
    kh, kw, cin, cout = w.shape
    assert kh == 3 and kw == 3 and width % 2 == 0
    wo_n = width // 2
    k_tap = width * cin
    mat = np.zeros((3, k_tap, wo_n * cout), np.float32)
    for i in range(3):
        for j in range(3):
            for wo in range(wo_n):
                col = 2 * wo + j - 1                      # actual input column
                if 0 <= col < width:
                    mat[i, col * cin:(col + 1) * cin,
                        wo * cout:(wo + 1) * cout] = w[i, j]
    brow = np.tile(b.reshape(1, 1, cout), (1, wo_n, 1)).reshape(1, wo_n * cout)
    return mat.reshape(3 * k_tap, wo_n * cout), brow


def _pack_deconv_s2(w_eq, b, wi, pad_to=None):
    """ConvTranspose2d(cin->cout, 3x3, s=2, p=1, output_padding=1), sub-pixel form.

      even output rows (2p)   = x_p @ m_even
      odd  output rows (2p+1) = [x_p | x_{p+1}] @ m_odd     (x_{wi} = 0)

    `w_eq` is the equivalent-forward-conv weight (kh, kw, cin, cout); pack_params
    converts the real PyTorch ConvTranspose2d layout into this.

    Returns m_even (wi*cin, lout), m_odd (2*wi*cin, lout), brow (1, lout);
    lout = 2*wi*cout, optionally zero-padded to `pad_to` lanes (padded lanes
    stay exactly 0 through bias + activation -> lane-dense output stores).
    """
    w = np.asarray(w_eq, np.float32)
    b = np.asarray(b, np.float32)
    kh, kw, cin, cout = w.shape
    assert kh == 3 and kw == 3
    k_row = wi * cin
    lout = 2 * wi * cout
    me = np.zeros((k_row, lout), np.float32)
    mo = np.zeros((2 * k_row, lout), np.float32)
    for q in range(wi):
        r0 = slice(q * cin, (q + 1) * cin)
        c0 = slice((2 * q) * cout, (2 * q + 1) * cout)
        c1 = slice((2 * q + 1) * cout, (2 * q + 2) * cout)
        # even rows: out[2p,2q]=x[p,q]W[1,1]; out[2p,2q+1]=x[p,q]W[1,0]+x[p,q+1]W[1,2]
        me[r0, c0] = w[1, 1]
        me[r0, c1] = w[1, 0]
        # odd rows, block 0 = contribution of input row p (kernel row 0 taps)
        mo[r0, c0] = w[0, 1]
        mo[r0, c1] = w[0, 0]
        # odd rows, block 1 = contribution of input row p+1 (kernel row 2 taps)
        mo[k_row + q * cin:k_row + (q + 1) * cin, c0] = w[2, 1]
        mo[k_row + q * cin:k_row + (q + 1) * cin, c1] = w[2, 0]
        if q + 1 < wi:
            r1 = slice((q + 1) * cin, (q + 2) * cin)
            me[r1, c1] = w[1, 2]
            mo[r1, c1] = w[0, 2]
            mo[k_row + (q + 1) * cin:k_row + (q + 2) * cin, c1] = w[2, 2]
    brow = np.tile(b.reshape(1, 1, cout), (1, 2 * wi, 1)).reshape(1, lout)
    if pad_to is not None and pad_to > lout:
        me = np.pad(me, ((0, 0), (0, pad_to - lout)))
        mo = np.pad(mo, ((0, 0), (0, pad_to - lout)))
        brow = np.pad(brow, ((0, 0), (0, pad_to - lout)))
    return me, mo, brow


# ----------------------------------------------------------------------------
# In-kernel helpers (pure value ops; no masked single-row stores anywhere).
# ----------------------------------------------------------------------------
def _prev_row_per_image(v, rows_per_image):
    """r[k] = v[k-1] within the same image, 0 at each image's first row."""
    prev = jnp.concatenate(
        [jnp.zeros((1, v.shape[1]), v.dtype), v[:-1, :]], axis=0)
    ridx = jax.lax.broadcasted_iota(jnp.int32, v.shape, 0)
    return jnp.where(ridx % rows_per_image == 0, 0.0, prev)


def _next_row_per_image(v, rows_per_image):
    """r[k] = v[k+1] within the same image, 0 at each image's last row."""
    nxt = jnp.concatenate(
        [v[1:, :], jnp.zeros((1, v.shape[1]), v.dtype)], axis=0)
    ridx = jax.lax.broadcasted_iota(jnp.int32, v.shape, 0)
    return jnp.where(ridx % rows_per_image == rows_per_image - 1, 0.0, nxt)


# ----------------------------------------------------------------------------
# The fused AutoEncoder kernel: encoder -> decoder -> L1, one pallas_call.
# ----------------------------------------------------------------------------
def _autoencoder_kernel(x_ref,
                        en1_m_ref, en1_b_ref, en2_m_ref, en2_b_ref,
                        de1_me_ref, de1_mo_ref, de1_b_ref,
                        de2_me_ref, de2_mo_ref, de2_b_ref,
                        gen_ref, l1_ref,
                        f1_ref,
                        *, imgs, h, wc, out_lanes):
    B = imgs
    ho1, ho2 = h // 2, h // 4
    mm = functools.partial(jnp.dot, preferred_element_type=jnp.float32)

    def conv_band(src_ref, n_out_rows, rows_per_out_image, dtype):
        """Band for a 3x3 stride-2 pad-1 conv: row m = [in(2m-1)|in(2m)|in(2m+1)].
        Two stride-2 sublane reads + one in-register row shift; no stores."""
        t1 = src_ref[pl.ds(0, n_out_rows, stride=2), :]      # input rows 2m
        t2 = src_ref[pl.ds(1, n_out_rows, stride=2), :]      # input rows 2m+1
        t0 = _prev_row_per_image(t2, rows_per_out_image)      # input rows 2m-1
        return jnp.concatenate([t0, t1, t2], axis=-1).astype(dtype)

    # ---------------- netEn conv1 (input_nc -> ngf) + ReLU : one fused GEMM --
    w = en1_m_ref[...]
    band = conv_band(x_ref, B * ho1, ho1, w.dtype)                       # (B*ho1, 3*wc)
    f1 = jnp.maximum(mm(band, w) + en1_b_ref[...], 0.0)                  # (B*ho1, wo1*ngf)
    f1_ref[...] = f1           # single full-block store so conv2 can read strided

    # ---------------- netEn conv2 (ngf -> 2*ngf) + ReLU : one fused GEMM -----
    w = en2_m_ref[...]
    band = conv_band(f1_ref, B * ho2, ho2, w.dtype)                      # (B*ho2, 3*K)
    f2 = jnp.maximum(mm(band, w) + en2_b_ref[...], 0.0)                  # (B*ho2, wo2*2ngf)

    # ---------------- netDe deconv1 (2*ngf -> ngf) + ReLU --------------------
    # sub-pixel decomposition: even output rows <- row p; odd <- rows p, p+1.
    w_e, w_o, db1 = de1_me_ref[...], de1_mo_ref[...], de1_b_ref[...]
    f2c = f2.astype(w_e.dtype)
    f2n = _next_row_per_image(f2, ho2).astype(w_e.dtype)
    ev1 = jnp.maximum(mm(f2c, w_e) + db1, 0.0)                           # rows 2p
    od1 = jnp.maximum(mm(jnp.concatenate([f2c, f2n], -1), w_o) + db1, 0.0)  # rows 2p+1

    # ---------------- netDe deconv2 (ngf -> output_nc) + Tanh ----------------
    # Rows stay phase-major (no in-kernel row interleave): de2 only needs every
    # g1 row paired with its in-image successor, so stack [even-r ; odd-r].
    w_e, w_o, db2 = de2_me_ref[...], de2_mo_ref[...], de2_b_ref[...]
    g_cur = jnp.concatenate([ev1, od1], axis=0).astype(w_e.dtype)        # g1[r]
    g_nxt = jnp.concatenate([od1, _next_row_per_image(ev1, ho2)],
                            axis=0).astype(w_e.dtype)                    # g1[r+1]
    ev2 = jnp.tanh(mm(g_cur, w_e) + db2)                                 # gen rows 2r
    od2 = jnp.tanh(mm(jnp.concatenate([g_cur, g_nxt], -1), w_o) + db2)   # gen rows 2r+1

    # phase-major generated image: [rows%4==0 ; ==1 ; ==2 ; ==3], images stacked
    # inside each phase block.  One lane-dense full-block store, never re-read.
    P = B * ho2
    gen = jnp.concatenate([ev2[:P], od2[:P], ev2[P:], od2[P:]], axis=0)  # (B*h, lanes)
    gen_ref[...] = gen

    # -------- fused L1 epilogue: sublane-reduced per-lane partial sums -------
    xp = jnp.concatenate(
        [x_ref[pl.ds(ph, P, stride=4), :] for ph in range(4)], axis=0)   # x, phase-major
    part = jnp.sum(jnp.abs(gen[:, :wc] - xp), axis=0, keepdims=True)     # (1, wc)
    pad = out_lanes - wc
    if pad > 0:
        part = jnp.concatenate([part, jnp.zeros((1, pad), jnp.float32)], axis=-1)
    l1_ref[...] = part


# ----------------------------------------------------------------------------
# Parameters (PyTorch layouts) + packing + public forward.
# ----------------------------------------------------------------------------
def init_params(key, input_nc=3, output_nc=3, ngf=8):
    """netEn: Conv(s2)+ReLU x2; netDe: ConvTranspose(s2)+ReLU, ConvTranspose(s2)+Tanh.
    Weights are kept in real PyTorch layouts:
      Conv2d          -> (cout, cin, 3, 3)
      ConvTranspose2d -> (cin, cout, 3, 3)
    """
    # TODO(synk): opt.norm normalization layers (instance/batch norm) omitted.
    ks = jax.random.split(key, 8)

    def conv_w(k, cin, cout):
        return jax.random.normal(k, (cout, cin, 3, 3), jnp.float32) * 0.05

    def deconv_w(k, cin, cout):
        return jax.random.normal(k, (cin, cout, 3, 3), jnp.float32) * 0.05

    def bias(k, c):
        return jax.random.uniform(k, (c,), jnp.float32, -0.05, 0.05)

    return {
        "en1_w": conv_w(ks[0], input_nc, ngf), "en1_b": bias(ks[1], ngf),
        "en2_w": conv_w(ks[2], ngf, 2 * ngf), "en2_b": bias(ks[3], 2 * ngf),
        "de1_w": deconv_w(ks[4], 2 * ngf, ngf), "de1_b": bias(ks[5], ngf),
        "de2_w": deconv_w(ks[6], ngf, output_nc), "de2_b": bias(ks[7], output_nc),
    }


def pack_params(params, image_size=16, lane_pad=128, matmul_dtype=jnp.bfloat16):
    """Fold im2col / sub-pixel tap selection into banded GEMM weights (once)."""
    h = image_size

    def conv_khwc(w):                       # PyTorch Conv2d -> (kh, kw, cin, cout)
        return np.transpose(np.asarray(w), (2, 3, 1, 0))

    def deconv_eq(w):                       # PyTorch ConvTranspose2d -> equiv. fwd conv
        return np.transpose(np.asarray(w), (2, 3, 0, 1))[::-1, ::-1]

    en1_m, en1_b = _pack_conv_s2(conv_khwc(params["en1_w"]), params["en1_b"], h)
    en2_m, en2_b = _pack_conv_s2(conv_khwc(params["en2_w"]), params["en2_b"], h // 2)
    de1_me, de1_mo, de1_b = _pack_deconv_s2(
        deconv_eq(params["de1_w"]), params["de1_b"], h // 4)
    de2_me, de2_mo, de2_b = _pack_deconv_s2(
        deconv_eq(params["de2_w"]), params["de2_b"], h // 2, pad_to=lane_pad)

    wd = lambda a: jnp.asarray(a, matmul_dtype)   # MXU operands (bf16 by default)
    fd = lambda a: jnp.asarray(a, jnp.float32)    # biases stay f32 (f32 accumulate)
    return {
        "en1_m": wd(en1_m), "en1_b": fd(en1_b),
        "en2_m": wd(en2_m), "en2_b": fd(en2_b),
        "de1_me": wd(de1_me), "de1_mo": wd(de1_mo), "de1_b": fd(de1_b),
        "de2_me": wd(de2_me), "de2_mo": wd(de2_mo), "de2_b": fd(de2_b),
    }


def autoencoder_forward(packed, image_nchw, infer=True, images_per_block=None):
    """Mirrors AutoEncoder.forward(image, infer): returns [losses, gen_image]."""
    n, c, h, w = image_nchw.shape
    assert h % 4 == 0
    wc = w * c
    lane_pad = packed["de2_me"].shape[-1]
    B = images_per_block if images_per_block is not None else n   # whole batch / step
    assert n % B == 0
    n_blocks = n // B

    # NCHW -> NHWC row layout (one boundary relayout; at real pix2pixHD sizes
    # keep the producer NHWC end-to-end instead of transposing here).
    x_rows = jnp.transpose(image_nchw, (0, 2, 3, 1)).reshape(n * h, wc)

    kernel = functools.partial(_autoencoder_kernel,
                               imgs=B, h=h, wc=wc, out_lanes=lane_pad)

    def wfull(a):
        return pl.BlockSpec(a.shape, lambda i: (0,) * a.ndim)

    gen_rows, l1_part = pl.pallas_call(
        kernel,
        out_shape=(jax.ShapeDtypeStruct((n * h, lane_pad), jnp.float32),
                   jax.ShapeDtypeStruct((n_blocks, lane_pad), jnp.float32)),
        grid=(n_blocks,),
        in_specs=[
            pl.BlockSpec((B * h, wc), lambda i: (i, 0)),
            wfull(packed["en1_m"]), wfull(packed["en1_b"]),
            wfull(packed["en2_m"]), wfull(packed["en2_b"]),
            wfull(packed["de1_me"]), wfull(packed["de1_mo"]), wfull(packed["de1_b"]),
            wfull(packed["de2_me"]), wfull(packed["de2_mo"]), wfull(packed["de2_b"]),
        ],
        out_specs=(pl.BlockSpec((B * h, lane_pad), lambda i: (i, 0)),
                   pl.BlockSpec((1, lane_pad), lambda i: (i, 0))),
        scratch_shapes=[
            pltpu.VMEM((B * (h // 2), packed["en1_m"].shape[-1]), jnp.float32),
        ],
        compiler_params=pltpu.CompilerParams(
            dimension_semantics=("parallel",),        # blocks across TCs (v7x)
            vmem_limit_bytes=32 * 1024 * 1024),
    )(x_rows, packed["en1_m"], packed["en1_b"], packed["en2_m"], packed["en2_b"],
      packed["de1_me"], packed["de1_mo"], packed["de1_b"],
      packed["de2_me"], packed["de2_mo"], packed["de2_b"])

    # Rows come back phase-major ([r%4==0; ==1; ==2; ==3] per block); the
    # un-permutation is folded into the single relayout back to NCHW.
    g = gen_rows.reshape(n_blocks, 4, B, h // 4, lane_pad)
    g = jnp.transpose(g, (0, 2, 3, 1, 4)).reshape(n, h, lane_pad)
    gen = g[:, :, :wc].reshape(n, h, w, c)
    gen_image = jnp.transpose(gen, (0, 3, 1, 2))

    # opt.no_vgg_loss = True -> VGG perceptual loss skipped.
    # TODO(synk): VGGLoss needs pretrained VGG19 features; no in-script equivalent.
    loss_G_l1 = jnp.sum(l1_part) / image_nchw.size        # opt.use_l1_loss = True
    losses = [loss_G_l1]                                  # loss_filter((False, True))
    return [losses, gen_image if infer else None]


if __name__ == "__main__":
    key = jax.random.PRNGKey(0)
    k_param, k_img = jax.random.split(key)
    params = init_params(k_param, input_nc=3, output_nc=3, ngf=8)
    packed = pack_params(params, image_size=16)
    image = jax.random.uniform(k_img, (2, 3, 16, 16), jnp.float32)   # NCHW like PyTorch

    fwd = jax.jit(functools.partial(autoencoder_forward, infer=True))
    losses, gen_image = fwd(packed, image)

    jax.block_until_ready(losses[0])
    jax.block_until_ready(gen_image)
    assert gen_image.shape == image.shape and gen_image.dtype == jnp.float32
    assert losses[0].shape == ()
    print("KERNEL_OK")
</pallas_src>

<mosaic_0001>
module attributes {stable_mosaic.version = 11 : i64} {
  func.func @_autoencoder_kernel(%arg0: i32, %arg1: memref<32x48xf32, #tpu.memory_space<vmem>>, %arg2: memref<144x64xbf16, #tpu.memory_space<vmem>>, %arg3: memref<1x64xf32, #tpu.memory_space<vmem>>, %arg4: memref<192x64xbf16, #tpu.memory_space<vmem>>, %arg5: memref<1x64xf32, #tpu.memory_space<vmem>>, %arg6: memref<64x64xbf16, #tpu.memory_space<vmem>>, %arg7: memref<128x64xbf16, #tpu.memory_space<vmem>>, %arg8: memref<1x64xf32, #tpu.memory_space<vmem>>, %arg9: memref<64x128xbf16, #tpu.memory_space<vmem>>, %arg10: memref<128x128xbf16, #tpu.memory_space<vmem>>, %arg11: memref<1x128xf32, #tpu.memory_space<vmem>>, %arg12: memref<32x128xf32, #tpu.memory_space<vmem>>, %arg13: memref<1x128xf32, #tpu.memory_space<vmem>>, %arg14: memref<16x64xf32, #tpu.memory_space<vmem>>) attributes {dimension_semantics = [#tpu.dimension_semantics<parallel>], iteration_bounds = array<i64: 1>, scalar_prefetch = 0 : i64, scratch_operands = 1 : i64, tpu.core_type = #tpu.core_type<tc>, window_params = [{transform_indices = @transform_0, window_bounds = array<i64: 32, 48>}, {pipeline_mode = #tpu.pipeline_mode<synchronous>, transform_indices = @transform_1, window_bounds = array<i64: 144, 64>}, {pipeline_mode = #tpu.pipeline_mode<synchronous>, transform_indices = @transform_2, window_bounds = array<i64: 1, 64>}, {pipeline_mode = #tpu.pipeline_mode<synchronous>, transform_indices = @transform_3, window_bounds = array<i64: 192, 64>}, {pipeline_mode = #tpu.pipeline_mode<synchronous>, transform_indices = @transform_4, window_bounds = array<i64: 1, 64>}, {pipeline_mode = #tpu.pipeline_mode<synchronous>, transform_indices = @transform_5, window_bounds = array<i64: 64, 64>}, {pipeline_mode = #tpu.pipeline_mode<synchronous>, transform_indices = @transform_6, window_bounds = array<i64: 128, 64>}, {pipeline_mode = #tpu.pipeline_mode<synchronous>, transform_indices = @transform_7, window_bounds = array<i64: 1, 64>}, {pipeline_mode = #tpu.pipeline_mode<synchronous>, transform_indices = @transform_8, window_bounds = array<i64: 64, 128>}, {pipeline_mode = #tpu.pipeline_mode<synchronous>, transform_indices = @transform_9, window_bounds = array<i64: 128, 128>}, {pipeline_mode = #tpu.pipeline_mode<synchronous>, transform_indices = @transform_10, window_bounds = array<i64: 1, 128>}, {transform_indices = @transform_11, window_bounds = array<i64: 32, 128>}, {transform_indices = @transform_12, window_bounds = array<i64: 1, 128>}]} {
    %c0 = arith.constant 0 : index
    %c0_0 = arith.constant 0 : index
    %0 = vector.load %arg2[%c0, %c0_0] : memref<144x64xbf16, #tpu.memory_space<vmem>>, vector<144x64xbf16>
    %c0_1 = arith.constant 0 : index
    %c0_2 = arith.constant 0 : index
    %1 = tpu.strided_load %arg1[%c0_1, %c0_2] {strides = array<i32: 2, 1>} : memref<32x48xf32, #tpu.memory_space<vmem>>, vector<16x48xf32>
    %c1 = arith.constant 1 : index
    %c0_3 = arith.constant 0 : index
    %2 = tpu.strided_load %arg1[%c1, %c0_3] {strides = array<i32: 2, 1>} : memref<32x48xf32, #tpu.memory_space<vmem>>, vector<16x48xf32>
    %cst = arith.constant 0.000000e+00 : f32
    %3 = vector.broadcast %cst : f32 to vector<1x48xf32>
    %4 = vector.extract_strided_slice %2 {offsets = [0, 0], sizes = [15, 48], strides = [1, 1]} : vector<16x48xf32> to vector<15x48xf32>
    %5 = tpu.concatenate %3, %4 in 0 : vector<1x48xf32>, vector<15x48xf32> -> vector<16x48xf32>
    %6 = tpu.iota {dimensions = array<i32: 0>} : vector<16x48xi32>
    %c8_i32 = arith.constant 8 : i32
    %c0_i32 = arith.constant 0 : i32
    %7 = arith.cmpi eq, %c8_i32, %c0_i32 : i32
    %c1_i32 = arith.constant 1 : i32
    %8 = arith.select %7, %c1_i32, %c8_i32 : i32
    %9 = vector.broadcast %8 : i32 to vector<16x48xi32>
    %10 = arith.remsi %6, %9 : vector<16x48xi32>
    %c0_i32_4 = arith.constant 0 : i32
    %11 = vector.broadcast %c0_i32_4 : i32 to vector<16x48xi32>
    %12 = arith.cmpi ne, %10, %11 : vector<16x48xi32>
    %c0_i32_5 = arith.constant 0 : i32
    %13 = vector.broadcast %c0_i32_5 : i32 to vector<16x48xi32>
    %14 = arith.cmpi slt, %10, %13 : vector<16x48xi32>
    %c0_i32_6 = arith.constant 0 : i32
    %15 = arith.cmpi slt, %8, %c0_i32_6 : i32
    %16 = vector.broadcast %15 : i1 to vector<16x48xi1>
    %17 = vector.broadcast %16 : vector<16x48xi1> to vector<16x48xi1>
    %18 = arith.xori %14, %17 : vector<16x48xi1>
    %19 = arith.andi %18, %12 : vector<16x48xi1>
    %20 = vector.broadcast %8 : i32 to vector<16x48xi32>
    %21 = arith.addi %10, %20 : vector<16x48xi32>
    %22 = arith.select %19, %21, %10 : vector<16x48xi1>, vector<16x48xi32>
    %c0_i32_7 = arith.constant 0 : i32
    %23 = vector.broadcast %c0_i32_7 : i32 to vector<16x48xi32>
    %24 = arith.cmpi eq, %22, %23 : vector<16x48xi32>
    %cst_8 = arith.constant 0.000000e+00 : f32
    %25 = vector.broadcast %cst_8 : f32 to vector<16x48xf32>
    %26 = arith.select %24, %25, %5 : vector<16x48xi1>, vector<16x48xf32>
    %27 = tpu.concatenate %26, %1, %2 in 1 : vector<16x48xf32>, vector<16x48xf32>, vector<16x48xf32> -> vector<16x144xf32>
    %28 = arith.truncf %27 : vector<16x144xf32> to vector<16x144xbf16>
    %cst_9 = arith.constant dense<0.000000e+00> : vector<16x64xf32>
    %29 = tpu.matmul %28, %0, %cst_9 {dimension_numbers = #tpu.dot_dimension_numbers<[1], [0], [0], [1], [0, 0, 1, 1], [], []>} : vector<16x144xbf16>, vector<144x64xbf16>, vector<16x64xf32> -> vector<16x64xf32>
    %c0_10 = arith.constant 0 : index
    %c0_11 = arith.constant 0 : index
    %30 = vector.load %arg3[%c0_10, %c0_11] : memref<1x64xf32, #tpu.memory_space<vmem>>, vector<1x64xf32>
    %31 = vector.broadcast %30 : vector<1x64xf32> to vector<16x64xf32>
    %32 = arith.addf %29, %31 : vector<16x64xf32>
    %cst_12 = arith.constant 0.000000e+00 : f32
    %33 = vector.broadcast %cst_12 : f32 to vector<16x64xf32>
    %34 = arith.maximumf %32, %33 : vector<16x64xf32>
    %c0_13 = arith.constant 0 : index
    %c0_14 = arith.constant 0 : index
    %35 = vector.load %arg14[%c0_13, %c0_14] : memref<16x64xf32, #tpu.memory_space<vmem>>, vector<16x64xf32>
    tpu.vector_store %arg14[%c0_13, %c0_14], %34 {strides = array<i32>} : memref<16x64xf32, #tpu.memory_space<vmem>>, vector<16x64xf32>,
    %c0_15 = arith.constant 0 : index
    %c0_16 = arith.constant 0 : index
    %36 = vector.load %arg4[%c0_15, %c0_16] : memref<192x64xbf16, #tpu.memory_space<vmem>>, vector<192x64xbf16>
    %c0_17 = arith.constant 0 : index
    %c0_18 = arith.constant 0 : index
    %37 = tpu.strided_load %arg14[%c0_17, %c0_18] {strides = array<i32: 2, 1>} : memref<16x64xf32, #tpu.memory_space<vmem>>, vector<8x64xf32>
    %c1_19 = arith.constant 1 : index
    %c0_20 = arith.constant 0 : index
    %38 = tpu.strided_load %arg14[%c1_19, %c0_20] {strides = array<i32: 2, 1>} : memref<16x64xf32, #tpu.memory_space<vmem>>, vector<8x64xf32>
    %cst_21 = arith.constant 0.000000e+00 : f32
    %39 = vector.broadcast %cst_21 : f32 to vector<1x64xf32>
    %40 = vector.extract_strided_slice %38 {offsets = [0, 0], sizes = [7, 64], strides = [1, 1]} : vector<8x64xf32> to vector<7x64xf32>
    %41 = tpu.concatenate %39, %40 in 0 : vector<1x64xf32>, vector<7x64xf32> -> vector<8x64xf32>
    %42 = tpu.iota {dimensions = array<i32: 0>} : vector<8x64xi32>
    %c4_i32 = arith.constant 4 : i32
    %c0_i32_22 = arith.constant 0 : i32
    %43 = arith.cmpi eq, %c4_i32, %c0_i32_22 : i32
    %c1_i32_23 = arith.constant 1 : i32
    %44 = arith.select %43, %c1_i32_23, %c4_i32 : i32
    %45 = vector.broadcast %44 : i32 to vector<8x64xi32>
    %46 = arith.remsi %42, %45 : vector<8x64xi32>
    %c0_i32_24 = arith.constant 0 : i32
    %47 = vector.broadcast %c0_i32_24 : i32 to vector<8x64xi32>
    %48 = arith.cmpi ne, %46, %47 : vector<8x64xi32>
    %c0_i32_25 = arith.constant 0 : i32
    %49 = vector.broadcast %c0_i32_25 : i32 to vector<8x64xi32>
    %50 = arith.cmpi slt, %46, %49 : vector<8x64xi32>
    %c0_i32_26 = arith.constant 0 : i32
    %51 = arith.cmpi slt, %44, %c0_i32_26 : i32
    %52 = vector.broadcast %51 : i1 to vector<8x64xi1>
    %53 = vector.broadcast %52 : vector<8x64xi1> to vector<8x64xi1>
    %54 = arith.xori %50, %53 : vector<8x64xi1>
    %55 = arith.andi %54, %48 : vector<8x64xi1>
    %56 = vector.broadcast %44 : i32 to vector<8x64xi32>
    %57 = arith.addi %46, %56 : vector<8x64xi32>
    %58 = arith.select %55, %57, %46 : vector<8x64xi1>, vector<8x64xi32>
    %c0_i32_27 = arith.constant 0 : i32
    %59 = vector.broadcast %c0_i32_27 : i32 to vector<8x64xi32>
    %60 = arith.cmpi eq, %58, %59 : vector<8x64xi32>
    %cst_28 = arith.constant 0.000000e+00 : f32
    %61 = vector.broadcast %cst_28 : f32 to vector<8x64xf32>
    %62 = arith.select %60, %61, %41 : vector<8x64xi1>, vector<8x64xf32>
    %63 = tpu.concatenate %62, %37, %38 in 1 : vector<8x64xf32>, vector<8x64xf32>, vector<8x64xf32> -> vector<8x192xf32>
    %64 = arith.truncf %63 : vector<8x192xf32> to vector<8x192xbf16>
    %cst_29 = arith.constant dense<0.000000e+00> : vector<8x64xf32>
    %65 = tpu.matmul %64, %36, %cst_29 {dimension_numbers = #tpu.dot_dimension_numbers<[1], [0], [0], [1], [0, 0, 1, 1], [], []>} : vector<8x192xbf16>, vector<192x64xbf16>, vector<8x64xf32> -> vector<8x64xf32>
    %c0_30 = arith.constant 0 : index
    %c0_31 = arith.constant 0 : index
    %66 = vector.load %arg5[%c0_30, %c0_31] : memref<1x64xf32, #tpu.memory_space<vmem>>, vector<1x64xf32>
    %67 = vector.broadcast %66 : vector<1x64xf32> to vector<8x64xf32>
    %68 = arith.addf %65, %67 : vector<8x64xf32>
    %cst_32 = arith.constant 0.000000e+00 : f32
    %69 = vector.broadcast %cst_32 : f32 to vector<8x64xf32>
    %70 = arith.maximumf %68, %69 : vector<8x64xf32>
    %c0_33 = arith.constant 0 : index
    %c0_34 = arith.constant 0 : index
    %71 = vector.load %arg6[%c0_33, %c0_34] : memref<64x64xbf16, #tpu.memory_space<vmem>>, vector<64x64xbf16>
    %c0_35 = arith.constant 0 : index
    %c0_36 = arith.constant 0 : index
    %72 = vector.load %arg7[%c0_35, %c0_36] : memref<128x64xbf16, #tpu.memory_space<vmem>>, vector<128x64xbf16>
    %c0_37 = arith.constant 0 : index
    %c0_38 = arith.constant 0 : index
    %73 = vector.load %arg8[%c0_37, %c0_38] : memref<1x64xf32, #tpu.memory_space<vmem>>, vector<1x64xf32>
    %74 = arith.truncf %70 : vector<8x64xf32> to vector<8x64xbf16>
    %75 = vector.extract_strided_slice %70 {offsets = [1, 0], sizes = [7, 64], strides = [1, 1]} : vector<8x64xf32> to vector<7x64xf32>
    %cst_39 = arith.constant 0.000000e+00 : f32
    %76 = vector.broadcast %cst_39 : f32 to vector<1x64xf32>
    %77 = tpu.concatenate %75, %76 in 0 : vector<7x64xf32>, vector<1x64xf32> -> vector<8x64xf32>
    %78 = tpu.iota {dimensions = array<i32: 0>} : vector<8x64xi32>
    %c4_i32_40 = arith.constant 4 : i32
    %c0_i32_41 = arith.constant 0 : i32
    %79 = arith.cmpi eq, %c4_i32_40, %c0_i32_41 : i32
    %c1_i32_42 = arith.constant 1 : i32
    %80 = arith.select %79, %c1_i32_42, %c4_i32_40 : i32
    %81 = vector.broadcast %80 : i32 to vector<8x64xi32>
    %82 = arith.remsi %78, %81 : vector<8x64xi32>
    %c0_i32_43 = arith.constant 0 : i32
    %83 = vector.broadcast %c0_i32_43 : i32 to vector<8x64xi32>
    %84 = arith.cmpi ne, %82, %83 : vector<8x64xi32>
    %c0_i32_44 = arith.constant 0 : i32
    %85 = vector.broadcast %c0_i32_44 : i32 to vector<8x64xi32>
    %86 = arith.cmpi slt, %82, %85 : vector<8x64xi32>
    %c0_i32_45 = arith.constant 0 : i32
    %87 = arith.cmpi slt, %80, %c0_i32_45 : i32
    %88 = vector.broadcast %87 : i1 to vector<8x64xi1>
    %89 = vector.broadcast %88 : vector<8x64xi1> to vector<8x64xi1>
    %90 = arith.xori %86, %89 : vector<8x64xi1>
    %91 = arith.andi %90, %84 : vector<8x64xi1>
    %92 = vector.broadcast %80 : i32 to vector<8x64xi32>
    %93 = arith.addi %82, %92 : vector<8x64xi32>
    %94 = arith.select %91, %93, %82 : vector<8x64xi1>, vector<8x64xi32>
    %c3_i32 = arith.constant 3 : i32
    %95 = vector.broadcast %c3_i32 : i32 to vector<8x64xi32>
    %96 = arith.cmpi eq, %94, %95 : vector<8x64xi32>
    %cst_46 = arith.constant 0.000000e+00 : f32
    %97 = vector.broadcast %cst_46 : f32 to vector<8x64xf32>
    %98 = arith.select %96, %97, %77 : vector<8x64xi1>, vector<8x64xf32>
    %99 = arith.truncf %98 : vector<8x64xf32> to vector<8x64xbf16>
    %cst_47 = arith.constant dense<0.000000e+00> : vector<8x64xf32>
    %100 = tpu.matmul %74, %71, %cst_47 {dimension_numbers = #tpu.dot_dimension_numbers<[1], [0], [0], [1], [0, 0, 1, 1], [], []>} : vector<8x64xbf16>, vector<64x64xbf16>, vector<8x64xf32> -> vector<8x64xf32>
    %101 = vector.broadcast %73 : vector<1x64xf32> to vector<8x64xf32>
    %102 = arith.addf %100, %101 : vector<8x64xf32>
    %cst_48 = arith.constant 0.000000e+00 : f32
    %103 = vector.broadcast %cst_48 : f32 to vector<8x64xf32>
    %104 = arith.maximumf %102, %103 : vector<8x64xf32>
    %105 = tpu.concatenate %74, %99 in 1 : vector<8x64xbf16>, vector<8x64xbf16> -> vector<8x128xbf16>
    %cst_49 = arith.constant dense<0.000000e+00> : vector<8x64xf32>
    %106 = tpu.matmul %105, %72, %cst_49 {dimension_numbers = #tpu.dot_dimension_numbers<[1], [0], [0], [1], [0, 0, 1, 1], [], []>} : vector<8x128xbf16>, vector<128x64xbf16>, vector<8x64xf32> -> vector<8x64xf32>
    %107 = vector.broadcast %73 : vector<1x64xf32> to vector<8x64xf32>
    %108 = arith.addf %106, %107 : vector<8x64xf32>
    %cst_50 = arith.constant 0.000000e+00 : f32
    %109 = vector.broadcast %cst_50 : f32 to vector<8x64xf32>
    %110 = arith.maximumf %108, %109 : vector<8x64xf32>
    %c0_51 = arith.constant 0 : index
    %c0_52 = arith.constant 0 : index
    %111 = vector.load %arg9[%c0_51, %c0_52] : memref<64x128xbf16, #tpu.memory_space<vmem>>, vector<64x128xbf16>
    %c0_53 = arith.constant 0 : index
    %c0_54 = arith.constant 0 : index
    %112 = vector.load %arg10[%c0_53, %c0_54] : memref<128x128xbf16, #tpu.memory_space<vmem>>, vector<128x128xbf16>
    %c0_55 = arith.constant 0 : index
    %c0_56 = arith.constant 0 : index
    %113 = vector.load %arg11[%c0_55, %c0_56] : memref<1x128xf32, #tpu.memory_space<vmem>>, vector<1x128xf32>
    %114 = tpu.concatenate %104, %110 in 0 : vector<8x64xf32>, vector<8x64xf32> -> vector<16x64xf32>
    %115 = arith.truncf %114 : vector<16x64xf32> to vector<16x64xbf16>
    %116 = vector.extract_strided_slice %104 {offsets = [1, 0], sizes = [7, 64], strides = [1, 1]} : vector<8x64xf32> to vector<7x64xf32>
    %cst_57 = arith.constant 0.000000e+00 : f32
    %117 = vector.broadcast %cst_57 : f32 to vector<1x64xf32>
    %118 = tpu.concatenate %116, %117 in 0 : vector<7x64xf32>, vector<1x64xf32> -> vector<8x64xf32>
    %119 = tpu.iota {dimensions = array<i32: 0>} : vector<8x64xi32>
    %c4_i32_58 = arith.constant 4 : i32
    %c0_i32_59 = arith.constant 0 : i32
    %120 = arith.cmpi eq, %c4_i32_58, %c0_i32_59 : i32
    %c1_i32_60 = arith.constant 1 : i32
    %121 = arith.select %120, %c1_i32_60, %c4_i32_58 : i32
    %122 = vector.broadcast %121 : i32 to vector<8x64xi32>
    %123 = arith.remsi %119, %122 : vector<8x64xi32>
    %c0_i32_61 = arith.constant 0 : i32
    %124 = vector.broadcast %c0_i32_61 : i32 to vector<8x64xi32>
    %125 = arith.cmpi ne, %123, %124 : vector<8x64xi32>
    %c0_i32_62 = arith.constant 0 : i32
    %126 = vector.broadcast %c0_i32_62 : i32 to vector<8x64xi32>
    %127 = arith.cmpi slt, %123, %126 : vector<8x64xi32>
    %c0_i32_63 = arith.constant 0 : i32
    %128 = arith.cmpi slt, %121, %c0_i32_63 : i32
    %129 = vector.broadcast %128 : i1 to vector<8x64xi1>
    %130 = vector.broadcast %129 : vector<8x64xi1> to vector<8x64xi1>
    %131 = arith.xori %127, %130 : vector<8x64xi1>
    %132 = arith.andi %131, %125 : vector<8x64xi1>
    %133 = vector.broadcast %121 : i32 to vector<8x64xi32>
    %134 = arith.addi %123, %133 : vector<8x64xi32>
    %135 = arith.select %132, %134, %123 : vector<8x64xi1>, vector<8x64xi32>
    %c3_i32_64 = arith.constant 3 : i32
    %136 = vector.broadcast %c3_i32_64 : i32 to vector<8x64xi32>
    %137 = arith.cmpi eq, %135, %136 : vector<8x64xi32>
    %cst_65 = arith.constant 0.000000e+00 : f32
    %138 = vector.broadcast %cst_65 : f32 to vector<8x64xf32>
    %139 = arith.select %137, %138, %118 : vector<8x64xi1>, vector<8x64xf32>
    %140 = tpu.concatenate %110, %139 in 0 : vector<8x64xf32>, vector<8x64xf32> -> vector<16x64xf32>
    %141 = arith.truncf %140 : vector<16x64xf32> to vector<16x64xbf16>
    %cst_66 = arith.constant dense<0.000000e+00> : vector<16x128xf32>
    %142 = tpu.matmul %115, %111, %cst_66 {dimension_numbers = #tpu.dot_dimension_numbers<[1], [0], [0], [1], [0, 0, 1, 1], [], []>} : vector<16x64xbf16>, vector<64x128xbf16>, vector<16x128xf32> -> vector<16x128xf32>
    %143 = vector.broadcast %113 : vector<1x128xf32> to vector<16x128xf32>
    %144 = arith.addf %142, %143 : vector<16x128xf32>
    %145 = math.tanh %144 : vector<16x128xf32>
    %146 = tpu.concatenate %115, %141 in 1 : vector<16x64xbf16>, vector<16x64xbf16> -> vector<16x128xbf16>
    %cst_67 = arith.constant dense<0.000000e+00> : vector<16x128xf32>
    %147 = tpu.matmul %146, %112, %cst_67 {dimension_numbers = #tpu.dot_dimension_numbers<[1], [0], [0], [1], [0, 0, 1, 1], [], []>} : vector<16x128xbf16>, vector<128x128xbf16>, vector<16x128xf32> -> vector<16x128xf32>
    %148 = vector.broadcast %113 : vector<1x128xf32> to vector<16x128xf32>
    %149 = arith.addf %147, %148 : vector<16x128xf32>
    %150 = math.tanh %149 : vector<16x128xf32>
    %151 = vector.extract_strided_slice %145 {offsets = [0, 0], sizes = [8, 128], strides = [1, 1]} : vector<16x128xf32> to vector<8x128xf32>
    %152 = vector.extract_strided_slice %150 {offsets = [0, 0], sizes = [8, 128], strides = [1, 1]} : vector<16x128xf32> to vector<8x128xf32>
    %153 = vector.extract_strided_slice %145 {offsets = [8, 0], sizes = [8, 128], strides = [1, 1]} : vector<16x128xf32> to vector<8x128xf32>
    %154 = vector.extract_strided_slice %150 {offsets = [8, 0], sizes = [8, 128], strides = [1, 1]} : vector<16x128xf32> to vector<8x128xf32>
    %155 = tpu.concatenate %151, %152, %153, %154 in 0 : vector<8x128xf32>, vector<8x128xf32>, vector<8x128xf32>, vector<8x128xf32> -> vector<32x128xf32>
    %c0_68 = arith.constant 0 : index
    %c0_69 = arith.constant 0 : index
    %156 = vector.load %arg12[%c0_68, %c0_69] : memref<32x128xf32, #tpu.memory_space<vmem>>, vector<32x128xf32>
    tpu.vector_store %arg12[%c0_68, %c0_69], %155 {strides = array<i32>} : memref<32x128xf32, #tpu.memory_space<vmem>>, vector<32x128xf32>,
    %c0_70 = arith.constant 0 : index
    %c0_71 = arith.constant 0 : index
    %157 = tpu.strided_load %arg1[%c0_70, %c0_71] {strides = array<i32: 4, 1>} : memref<32x48xf32, #tpu.memory_space<vmem>>, vector<8x48xf32>
    %c1_72 = arith.constant 1 : index
    %c0_73 = arith.constant 0 : index
    %158 = tpu.strided_load %arg1[%c1_72, %c0_73] {strides = array<i32: 4, 1>} : memref<32x48xf32, #tpu.memory_space<vmem>>, vector<8x48xf32>
    %c2 = arith.constant 2 : index
    %c0_74 = arith.constant 0 : index
    %159 = tpu.strided_load %arg1[%c2, %c0_74] {strides = array<i32: 4, 1>} : memref<32x48xf32, #tpu.memory_space<vmem>>, vector<8x48xf32>
    %c3 = arith.constant 3 : index
    %c0_75 = arith.constant 0 : index
    %160 = tpu.strided_load %arg1[%c3, %c0_75] {strides = array<i32: 4, 1>} : memref<32x48xf32, #tpu.memory_space<vmem>>, vector<8x48xf32>
    %161 = tpu.concatenate %157, %158, %159, %160 in 0 : vector<8x48xf32>, vector<8x48xf32>, vector<8x48xf32>, vector<8x48xf32> -> vector<32x48xf32>
    %162 = vector.extract_strided_slice %155 {offsets = [0, 0], sizes = [32, 48], strides = [1, 1]} : vector<32x128xf32> to vector<32x48xf32>
    %163 = arith.subf %162, %161 : vector<32x48xf32>
    %164 = math.absf %163 : vector<32x48xf32>
    %cst_76 = arith.constant dense<0.000000e+00> : vector<48xf32>
    %165 = vector.multi_reduction <add>, %164, %cst_76 [0] : vector<32x48xf32> to vector<48xf32>
    %166 = vector.shape_cast %165 : vector<48xf32> to vector<1x48xf32>
    %cst_77 = arith.constant 0.000000e+00 : f32
    %167 = vector.broadcast %cst_77 : f32 to vector<1x80xf32>
    %168 = tpu.concatenate %166, %167 in 1 : vector<1x48xf32>, vector<1x80xf32> -> vector<1x128xf32>
    %c0_78 = arith.constant 0 : index
    %c0_79 = arith.constant 0 : index
    %169 = vector.load %arg13[%c0_78, %c0_79] : memref<1x128xf32, #tpu.memory_space<vmem>>, vector<1x128xf32>
    tpu.vector_store %arg13[%c0_78, %c0_79], %168 {strides = array<i32>} : memref<1x128xf32, #tpu.memory_space<vmem>>, vector<1x128xf32>,
    return
  }
  func.func @transform_0(%arg0: i32) -> (i32, i32) {
    %c0_i32 = arith.constant 0 : i32
    %c0_i32_0 = arith.constant 0 : i32
    return %arg0, %c0_i32 : i32, i32
  }
  func.func @transform_1(%arg0: i32) -> (i32, i32) {
    %c0_i32 = arith.constant 0 : i32
    %c0_i32_0 = arith.constant 0 : i32
    %c0_i32_1 = arith.constant 0 : i32
    return %c0_i32, %c0_i32_0 : i32, i32
  }
  func.func @transform_2(%arg0: i32) -> (i32, i32) {
    %c0_i32 = arith.constant 0 : i32
    %c0_i32_0 = arith.constant 0 : i32
    %c0_i32_1 = arith.constant 0 : i32
    return %c0_i32, %c0_i32_0 : i32, i32
  }
  func.func @transform_3(%arg0: i32) -> (i32, i32) {
    %c0_i32 = arith.constant 0 : i32
    %c0_i32_0 = arith.constant 0 : i32
    %c0_i32_1 = arith.constant 0 : i32
    return %c0_i32, %c0_i32_0 : i32, i32
  }
  func.func @transform_4(%arg0: i32) -> (i32, i32) {
    %c0_i32 = arith.constant 0 : i32
    %c0_i32_0 = arith.constant 0 : i32
    %c0_i32_1 = arith.constant 0 : i32
    return %c0_i32, %c0_i32_0 : i32, i32
  }
  func.func @transform_5(%arg0: i32) -> (i32, i32) {
    %c0_i32 = arith.constant 0 : i32
    %c0_i32_0 = arith.constant 0 : i32
    %c0_i32_1 = arith.constant 0 : i32
    return %c0_i32, %c0_i32_0 : i32, i32
  }
  func.func @transform_6(%arg0: i32) -> (i32, i32) {
    %c0_i32 = arith.constant 0 : i32
    %c0_i32_0 = arith.constant 0 : i32
    %c0_i32_1 = arith.constant 0 : i32
    return %c0_i32, %c0_i32_0 : i32, i32
  }
  func.func @transform_7(%arg0: i32) -> (i32, i32) {
    %c0_i32 = arith.constant 0 : i32
    %c0_i32_0 = arith.constant 0 : i32
    %c0_i32_1 = arith.constant 0 : i32
    return %c0_i32, %c0_i32_0 : i32, i32
  }
  func.func @transform_8(%arg0: i32) -> (i32, i32) {
    %c0_i32 = arith.constant 0 : i32
    %c0_i32_0 = arith.constant 0 : i32
    %c0_i32_1 = arith.constant 0 : i32
    return %c0_i32, %c0_i32_0 : i32, i32
  }
  func.func @transform_9(%arg0: i32) -> (i32, i32) {
    %c0_i32 = arith.constant 0 : i32
    %c0_i32_0 = arith.constant 0 : i32
    %c0_i32_1 = arith.constant 0 : i32
    return %c0_i32, %c0_i32_0 : i32, i32
  }
  func.func @transform_10(%arg0: i32) -> (i32, i32) {
    %c0_i32 = arith.constant 0 : i32
    %c0_i32_0 = arith.constant 0 : i32
    %c0_i32_1 = arith.constant 0 : i32
    return %c0_i32, %c0_i32_0 : i32, i32
  }
  func.func @transform_11(%arg0: i32) -> (i32, i32) {
    %c0_i32 = arith.constant 0 : i32
    %c0_i32_0 = arith.constant 0 : i32
    return %arg0, %c0_i32 : i32, i32
  }
  func.func @transform_12(%arg0: i32) -> (i32, i32) {
    %c0_i32 = arith.constant 0 : i32
    %c0_i32_0 = arith.constant 0 : i32
    return %arg0, %c0_i32 : i32, i32
  }
}

</mosaic_0001>

<bundles_post_ra>
// kernel: autoencoder_forward.1
= control target key start
LH: loop header
LB: loop body
LE: loop exit
PB: predicated region body
PF: predicated region fallthrough
CT: control target
= control target key end

     0   :  { %vm68_vm0 = vcmask 1040384   ;;  %v1083_v3 = vmov 0   ;;  %s1084_s13 = smov 48   ;;  %s1085_s16 = smov 96   ;;  %v75_v19 = vlaneseq  ;;  %vm120_vm3 = vcmask 392192   ;;  %s1429_s0 = inlined_call_operand.vmem [shape: f32[32,48], index: 0, kind: input, shape index: {}]   ;;  %s1430_s1 = inlined_call_operand.vmem [shape: bf16[144,64], index: 1, kind: input, shape index: {}]   ;;  %s1431_s3 = inlined_call_operand.vmem [shape: bf16[192,64], index: 3, kind: input, shape index: {}]   ;;  %s1432_s2 = inlined_call_operand.vmem [shape: f32[1,64], index: 2, kind: input, shape index: {}]   ;;  %s1433_s5 = inlined_call_operand.vmem [shape: bf16[64,64], index: 5, kind: input, shape index: {}]   ;;  %s1434_s6 = inlined_call_operand.vmem [shape: bf16[128,64], index: 6, kind: input, shape index: {}]   ;;  %s1435_s4 = inlined_call_operand.vmem [shape: f32[1,64], index: 4, kind: input, shape index: {}]   ;;  %s1436_s8 = inlined_call_operand.vmem [shape: bf16[64,128], index: 8, kind: input, shape index: {}]   ;;  %s1437_s9 = inlined_call_operand.vmem [shape: bf16[128,128], index: 9, kind: input, shape index: {}]   ;;  %s1438_s7 = inlined_call_operand.vmem [shape: f32[1,64], index: 7, kind: input, shape index: {}]   ;;  %s1439_s10 = inlined_call_operand.vmem [shape: f32[1,128], index: 10, kind: input, shape index: {}]   ;;  %s1440_s11 = inlined_call_operand.vmem [shape: f32[32,128], index: 11, kind: output, shape index: {0}]   ;;  %s1441_s12 = inlined_call_operand.vmem [shape: f32[1,128], index: 12, kind: output, shape index: {1}]  }
   0x1   :  { %v59_v0 = vld [vmem:[%s1429_s0] ss:$2 sm:$0xff]  ;;  %v863_v1 = vld [vmem:[%s1429_s0 + $0x10] ss:$2 sm:$0xff]  ;;  %v864_v2 = vld [vmem:[%s1429_s0 + $0x1] ss:$2 sm:$0xff]  ;;  %193 = vmatprep.subr.bf16.mxu0 %v1083_v3  ;;  %373 = vmatprep.subr.bf16.mxu1 %v1083_v3 }
   0x2   :  { %v1020_v4 = vpack.i.bf16 %v863_v1, %v59_v0  ;;  %v865_v5 = vld [vmem:[%s1429_s0 + $0x11] ss:$2 sm:$0xff]  ;;  %v69_v6 = vrot.slane %v864_v2, 7  ;;  %v1032_v12 = vld [vmem:[%s1430_s1 + $0x28] sm:$0xff]   ;;  %v1033_v13 = vld [vmem:[%s1430_s1 + $0x20] sm:$0xff]   ;;  %v1204_v20 = vshrl.u32 %v75_v19, 7 }
   0x3   :  { %v1030_v7 = vld [vmem:[%s1430_s1 + $0x38] sm:$0xff]   ;;  %v70_v8 = vrot.slane %v865_v5, 7  ;;  %v1025_v9 = vpack.i.bf16 %v865_v5, %v864_v2  ;;  %v1031_v10 = vld [vmem:[%s1430_s1 + $0x30] sm:$0xff]   ;;  %v1036_v16 = vld [vmem:[%s1430_s1 + $0x8] sm:$0xff]   ;;  %vm123_vm4 = vcmask 785408   ;;  %vm189_vm5 = vcmask 130048  }
   0x4   :  { %1021 = vrot.lane.b32.xlu0 %v1020_v4, %s1084_s13  ;;  %194 = vmatpush1.bf16.msra.mxu0 %v1030_v7  ;;  %v1034_v14 = vld [vmem:[%s1430_s1 + $0x18] sm:$0xff]   ;;  %v1035_v15 = vld [vmem:[%s1430_s1 + $0x10] sm:$0xff]   ;;  %v1037_v17 = vld [vmem:[%s1430_s1] sm:$0xff]   ;;  %v77_v21 = vadd.s32 8, %v1204_v20  ;;  %v82_v22 = vand.u32 7, %v1204_v20  ;;  %v74_v24 = vsel %vm68_vm0, 0.0, %v69_v6 }
   0x5   :  { %195 = vmatprep.subr.bf16.mxu0 %v1083_v3  ;;  %v71_v11 = vsel %vm68_vm0, %v69_v6, %v70_v8  ;;  %v1038_v18 = vld [vmem:[%s1430_s1 + $0x40] sm:$0xff]   ;;  %v1039_v39 = vld [vmem:[%s1431_s3 + $0x38] sm:$0xff]   ;;  %v1040_v40 = vld [vmem:[%s1431_s3 + $0x30] sm:$0xff]   ;;  %vm236_vm6 = vcmask 523264   ;;  %v1086_v60 = vmov 0.0   ;;  %v274_v1 = vand.u32 3, %v1204_v20 }
   0x6   :  { %v89_v23 = vand.u32 7, %v77_v21  ;;  %vm102_vm1 = vcmp.eq.s32.totalorder %v82_v22, 0  ;;  %374 = vmatpush1.bf16.msra.mxu1 %v1039_v39  ;;  %v1041_v41 = vld [vmem:[%s1431_s3 + $0x28] sm:$0xff]   ;;  %v1042_v42 = vld [vmem:[%s1431_s3 + $0x20] sm:$0xff]   ;;  %v1043_v43 = vld [vmem:[%s1431_s3 + $0x18] sm:$0xff]   ;;  %vm1088_vm8 = vmmov 0  }
   0x7   :  { %v104_v28 = vsel %vm102_vm1, 0.0, %v74_v24  ;;  %375 = vmatprep.subr.bf16.mxu1 %v1083_v3  ;;  %v1044_v44 = vld [vmem:[%s1431_s3 + $0x10] sm:$0xff]   ;;  %v1045_v45 = vld [vmem:[%s1431_s3 + $0x8] sm:$0xff]   ;;  %v1046_v46 = vld [vmem:[%s1431_s3] sm:$0xff]   ;;  %vm282_vm7 = vcmp.eq.s32.totalorder %v274_v1, 0  ;;  %vm443_vm9 = vcmask 1046528  }
   0x8   :  { %1026 = vrot.lane.b32.xlu0 %v1025_v9, %s1085_s16  ;;  %196 = vmatpush1.bf16.msra.mxu0 %v1031_v10  ;;  %vm103_vm2 = vcmp.eq.s32.totalorder %v89_v23, 0  ;;  %v1047_v47 = vld [vmem:[%s1431_s3 + $0x58] sm:$0xff]   ;;  %v1048_v48 = vld [vmem:[%s1431_s3 + $0x50] sm:$0xff]   ;;  %v1049_v49 = vld [vmem:[%s1431_s3 + $0x48] sm:$0xff]   ;;  %vm1296_vm10 = vcmp.eq.s32.totalorder %v274_v1, 3 }
   0x9   :  { %197 = vmatprep.subr.bf16.mxu0 %v1083_v3  ;;  %v105_v29 = vsel %vm103_vm2, 0.0, %v71_v11  ;;  %v866_v50 = vld [vmem:[%s1432_s2] ss:$0 sm:$0xff]  ;;  %s1087_s2 = smov 64   ;;  %v1051_v6 = vld [vmem:[%s1433_s5 + $0x18] sm:$0xff]   ;;  %v1052_v8 = vld [vmem:[%s1433_s5 + $0x10] sm:$0xff]  }
   0xa   :  { %376 = vmatpush1.bf16.msra.mxu1 %v1040_v40  ;;  %v1050_v54 = vld [vmem:[%s1431_s3 + $0x40] sm:$0xff]   ;;  %v1053_v9 = vld [vmem:[%s1433_s5 + $0x8] sm:$0xff]   ;;  %v1056_v24 = vld [vmem:[%s1434_s6 + $0x30] sm:$0xff]  }
   0xb   :  { %377 = vmatprep.subr.bf16.mxu1 %v1083_v3  ;;  %v1054_v10 = vld [vmem:[%s1433_s5] sm:$0xff]  }
   0xc   :  { %198 = vmatpush1.bf16.msra.mxu0 %v1032_v12  ;;  %v877_v11 = vld [vmem:[%s1435_s4] ss:$0 sm:$0xff]  ;;  %v919_v20 = vld [vmem:[%s1429_s0 + $0x1] ss:$4 sm:$0xff] }
   0xd   :  { %199 = vmatprep.subr.bf16.mxu0 %v1083_v3 }
   0xe   :  { %378 = vmatpush1.bf16.msra.mxu1 %v1041_v41 }
   0xf   :  { %379 = vmatprep.subr.bf16.mxu1 %v1083_v3 }
  0x10   :  { %200 = vmatpush1.bf16.msra.mxu0 %v1033_v13 }
  0x11   :  { %201 = vmatprep.subr.bf16.mxu0 %v1083_v3 }
  0x12   :  { %380 = vmatpush1.bf16.msra.mxu1 %v1042_v42  ;;  %v891_v42 = vld [vmem:[%s1438_s7] ss:$0 sm:$0xff] }
  0x13   :  { %381 = vmatprep.subr.bf16.mxu1 %v1083_v3 }
  0x14   :  { %202 = vmatpush1.bf16.msra.mxu0 %v1034_v14 }
  0x15   :  { %203 = vmatprep.subr.bf16.mxu0 %v1083_v3 }
  0x16   :  { %382 = vmatpush1.bf16.msra.mxu1 %v1043_v43 }
  0x17   :  { %383 = vmatprep.subr.bf16.mxu1 %v1083_v3 }
  0x18   :  { %204 = vmatpush1.bf16.msra.mxu0 %v1035_v15 }
  0x19   :  { %205 = vmatprep.subr.bf16.mxu0 %v1083_v3 }
  0x1a   :  { %384 = vmatpush1.bf16.msra.mxu1 %v1044_v44 }
  0x1b   :  { %385 = vmatprep.subr.bf16.mxu1 %v1083_v3 }
  0x1c   :  { %206 = vmatpush1.bf16.msra.mxu0 %v1036_v16 }
  0x1d   :  { %207 = vmatprep.subr.bf16.mxu0 %v1083_v3 }
  0x1e   :  { %386 = vmatpush1.bf16.msra.mxu1 %v1045_v45 }
  0x1f   :  { %387 = vmatprep.subr.bf16.mxu1 %v1083_v3 }
  0x20   :  { %208 = vmatpush1.bf16.msra.mxu0 %v1037_v17  ;;  %v1055_v17 = vld [vmem:[%s1434_s6 + $0x38] sm:$0xff]  }
  0x21   :  { %223 = vmatprep.subr.bf16.mxu0 %v1083_v3 }
  0x22   :  { %388 = vmatpush1.bf16.msra.mxu1 %v1046_v46 }
  0x23   :  { %397 = vmatprep.subr.bf16.mxu1 %v1083_v3 }
  0x24   :  { %224 = vmatpush2.bf16.msra.mxu0 %v1038_v18 }
  0x25   :  { %982 = vmatprep.subr.bf16.mxu0 %v1086_v60 }
  0x26   :  { %398 = vmatpush2.bf16.msra.mxu1 %v1047_v47 }
  0x27   :  { %399 = vmatprep.subr.bf16.mxu1 %v1083_v3 }
  0x2a   :  { %400 = vmatpush2.bf16.msra.mxu1 %v1048_v48 }
  0x2b   :  { %401 = vmatprep.subr.bf16.mxu1 %v1083_v3 }
  0x2e   :  { %402 = vmatpush2.bf16.msra.mxu1 %v1049_v49 }
  0x2f   :  { %403 = vmatprep.subr.bf16.mxu1 %v1083_v3 }
  0x32   :  { %404 = vmatpush2.bf16.msra.mxu1 %v1050_v54 }
  0x33   :  { %950 = vmatprep.subr.bf16.mxu1 %v1086_v60 }
  0x76   :  { %v1022_v25 = vpop.permute.xlu0 %1021 }
  0x77   :  { %v1024_v26 = vunpack.i.h.bf16 %v1022_v25  ;;  %v1023_v27 = vunpack.i.l.bf16 %v1022_v25 }
  0x79   :  { %v122_v33 = vsel %vm120_vm3, %v105_v29, %v1024_v26  ;;  %v121_v34 = vsel %vm120_vm3, %v104_v28, %v1023_v27  ;;  %v1057_v26 = vld [vmem:[%s1434_s6 + $0x28] sm:$0xff]   ;;  %v1058_v27 = vld [vmem:[%s1434_s6 + $0x20] sm:$0xff]   ;;  %v1059_v28 = vld [vmem:[%s1434_s6 + $0x18] sm:$0xff]  }
  0x7a   :  { %v1027_v30 = vpop.permute.xlu0 %1026  ;;  %v1060_v29 = vld [vmem:[%s1434_s6 + $0x10] sm:$0xff]  }
  0x7b   :  { %v1029_v31 = vunpack.i.h.bf16 %v1027_v30  ;;  %v1028_v32 = vunpack.i.l.bf16 %v1027_v30  ;;  %v1061_v30 = vld [vmem:[%s1434_s6 + $0x8] sm:$0xff]  }
  0x7d   :  { %v127_v35 = vpack.c.bf16 %v1029_v31, %v1028_v32  ;;  %v124_v36 = vsel %vm123_vm4, %v121_v34, %v1028_v32  ;;  %v125_v37 = vsel %vm123_vm4, %v122_v33, %v1029_v31  ;;  %v1062_v31 = vld [vmem:[%s1434_s6] sm:$0xff]   ;;  %v1063_v32 = vld [vmem:[%s1436_s8 + $0x18] sm:$0xff]   ;;  %v1064_v33 = vld [vmem:[%s1436_s8 + $0x10] sm:$0xff]  }
  0x7e   :  { %v126_v38 = vpack.c.bf16 %v125_v37, %v124_v36  ;;  %v1065_v36 = vld [vmem:[%s1436_s8 + $0x8] sm:$0xff]   ;;  %v1066_v37 = vld [vmem:[%s1436_s8] sm:$0xff]  }
  0x7f   :  { %876 = vmatprep.mubr.msk.bf16.mxu0 %vm189_vm5, %v127_v35 }
  0x80   :  { %226 = vmatmul.mubr.bf16.vlgmr.msra.gmra.mxu0 %v126_v38 }
  0x81   :  { %990 = vmatprep.mubr.msk.bf16.mxu0 %vm1088_vm8, %v1086_v60  ;;  %983 = vmatpush3.bf16.msra.mxu0 %v1063_v32 }
  0x82   :  { %984 = vmatprep.subr.bf16.mxu0 %v1086_v60 }
  0x85   :  { %985 = vmatpush3.bf16.msra.mxu0 %v1064_v33 }
  0x86   :  { %986 = vmatprep.subr.bf16.mxu0 %v1086_v60 }
  0x89   :  { %987 = vmatpush3.bf16.msra.mxu0 %v1065_v36 }
  0x8a   :  { %988 = vmatprep.subr.bf16.mxu0 %v1086_v60 }
  0x8d   :  { %989 = vmatpush3.bf16.msra.mxu0 %v1066_v37 }
  0x8e   :  { %994 = vmatprep.subr.bf16.mxu0 %v1086_v60 }
 0x140   :  { %v227_v51 = vpop.f32.mrf.mxu0 }
 0x141   :  { %v228_v52 = vadd.f32 %v866_v50, %v227_v51 }
 0x142   :  { %v229_v53 = vpop.f32.mrf.mxu0 }
 0x143   :  { %v234_v55 = vmax.f32 %v228_v52, 0.0  ;;  %v1067_v53 = vld [vmem:[%s1437_s9 + $0x38] sm:$0xff]  }
 0x144   :  { %v230_v56 = vpop.f32.mrf.mxu0 }
 0x145   :  { %237 = vst.msk [vmem:[#allocation2] sm:$0xff] %vm236_vm6, %v234_v55  ;;  %v231_v57 = vadd.f32 %v866_v50, %v230_v56 }
 0x146   :  { %v232_v58 = vpop.f32.mrf.mxu0 }
 0x147   :  { %v235_v59 = vmax.f32 %v231_v57, 0.0  ;;  %v1068_v57 = vld [vmem:[%s1437_s9 + $0x30] sm:$0xff]   ;;  %v1069_v58 = vld [vmem:[%s1437_s9 + $0x28] sm:$0xff]  }
 0x149   :  { %238 = vst.msk [vmem:[#allocation2 + $0x8] sm:$0xff] %vm236_vm6, %v235_v59  ;;  %v1070_v59 = vld [vmem:[%s1437_s9 + $0x20] sm:$0xff]  }
 0x150   :  { %v263_v61 = vld [vmem:[#allocation2] ss:$2 sm:$0xff]  ;;  %v265_v62 = vld [vmem:[#allocation2 + $0x1] ss:$2 sm:$0xff] }
 0x151   :  { %285 = vrot.lane.b32.xlu1 %v263_v61, %s1087_s2  ;;  %v290_v63 = vpack.c.bf16 %v265_v62, %v265_v62  ;;  %v267_v0 = vrot.slane %v265_v62, 7  ;;  %v1071_v61 = vld [vmem:[%s1437_s9 + $0x18] sm:$0xff]   ;;  %v1072_v62 = vld [vmem:[%s1437_s9 + $0x10] sm:$0xff]  }
 0x153   :  { %890 = vmatprep.mubr.msk.bf16.mxu1 %vm236_vm6, %v290_v63  ;;  %v269_v2 = vsel %vm68_vm0, 0.0, %v267_v0  ;;  %v1073_v63 = vld [vmem:[%s1437_s9 + $0x8] sm:$0xff]   ;;  %v1074_v0 = vld [vmem:[%s1437_s9] sm:$0xff]  }
 0x154   :  { %v283_v3 = vsel %vm282_vm7, 0.0, %v269_v2 }
 0x1c3   :  { %v286_v4 = vpop.permute.xlu1 %285 }
 0x1c4   :  { %v288_v5 = vsel %vm236_vm6, %v283_v3, %v286_v4  ;;  %v905_v3 = vld [vmem:[%s1439_s10] ss:$0 sm:$0xff] }
 0x1c5   :  { %v289_v7 = vpack.c.bf16 %v288_v5, %v288_v5 }
 0x1c7   :  { %406 = vmatmul.mubr.bf16.vlgmr.msra.gmra.mxu1 %v289_v7 }
 0x1c8   :  { %951 = vmatpush3.bf16.msra.mxu1 %v1051_v6  ;;  %958 = vmatprep.mubr.msk.bf16.mxu1 %vm1088_vm8, %v1086_v60 }
 0x1c9   :  { %952 = vmatprep.subr.bf16.mxu1 %v1086_v60 }
 0x1cc   :  { %953 = vmatpush3.bf16.msra.mxu1 %v1052_v8 }
 0x1cd   :  { %954 = vmatprep.subr.bf16.mxu1 %v1086_v60 }
 0x1d0   :  { %955 = vmatpush3.bf16.msra.mxu1 %v1053_v9 }
 0x1d1   :  { %956 = vmatprep.subr.bf16.mxu1 %v1086_v60 }
 0x1d4   :  { %957 = vmatpush3.bf16.msra.mxu1 %v1054_v10 }
 0x1d5   :  { %962 = vmatprep.subr.bf16.mxu1 %v1086_v60 }
 0x287   :  { %v407_v12 = vpop.f32.mrf.mxu1 }
 0x288   :  { %v408_v13 = vadd.f32 %v877_v11, %v407_v12 }
 0x289   :  { %v409_v14 = vpop.f32.mrf.mxu1 }
 0x28a   :  { %v413_v15 = vmax.f32 %v408_v13, 0.0 }
 0x28b   :  { %v410_v16 = vpop.f32.mrf.mxu1 }
 0x28c   :  { %v439_v18 = vpack.c.bf16 %v413_v15, %v413_v15  ;;  %v441_v19 = vrot.slane %v413_v15, 1 }
 0x28d   :  { %v411_v21 = vpop.f32.mrf.mxu1 }
 0x28e   :  { %v444_v22 = vsel %vm443_vm9, %v441_v19, 0.0  ;;  %959 = vmatmul.mubr.msk.bf16.vlgmr.msra.gmra.mxu1 %vm236_vm6, %v439_v18 }
 0x28f   :  { %v446_v23 = vsel %vm1296_vm10, 0.0, %v444_v22  ;;  %963 = vmatpush3.bf16.msra.mxu1 %v1055_v17  ;;  %978 = vmatprep.mubr.msk.bf16.mxu1 %vm1088_vm8, %v1086_v60  ;;  %v826_v17 = vld [vmem:[%s1429_s0] ss:$4 sm:$0xff] }
 0x290   :  { %v447_v25 = vpack.c.bf16 %v446_v23, %v446_v23  ;;  %964 = vmatprep.subr.bf16.mxu1 %v1086_v60 }
 0x292   :  { %523 = vrot.lane.b32.xlu1 %v447_v25, %s1087_s2  ;;  %v921_v25 = vld [vmem:[%s1429_s0 + $0x3] ss:$4 sm:$0xff] }
 0x293   :  { %965 = vmatpush3.bf16.msra.mxu1 %v1056_v24 }
 0x294   :  { %966 = vmatprep.subr.bf16.mxu1 %v1086_v60 }
 0x297   :  { %967 = vmatpush3.bf16.msra.mxu1 %v1057_v26 }
 0x298   :  { %968 = vmatprep.subr.bf16.mxu1 %v1086_v60 }
 0x29b   :  { %969 = vmatpush3.bf16.msra.mxu1 %v1058_v27 }
 0x29c   :  { %970 = vmatprep.subr.bf16.mxu1 %v1086_v60 }
 0x29f   :  { %971 = vmatpush3.bf16.msra.mxu1 %v1059_v28 }
 0x2a0   :  { %972 = vmatprep.subr.bf16.mxu1 %v1086_v60 }
 0x2a3   :  { %973 = vmatpush3.bf16.msra.mxu1 %v1060_v29 }
 0x2a4   :  { %974 = vmatprep.subr.bf16.mxu1 %v1086_v60 }
 0x2a7   :  { %975 = vmatpush3.bf16.msra.mxu1 %v1061_v30 }
 0x2a8   :  { %976 = vmatprep.subr.bf16.mxu1 %v1086_v60 }
 0x2ab   :  { %977 = vmatpush3.bf16.msra.mxu1 %v1062_v31 }
 0x304   :  { %v524_v34 = vpop.permute.xlu1 %523 }
 0x305   :  { %v526_v35 = vsel %vm236_vm6, %v439_v18, %v524_v34  ;;  %v920_v18 = vld [vmem:[%s1429_s0 + $0x2] ss:$4 sm:$0xff] }
 0x306   :  { %979 = vmatmul.mubr.bf16.vlgmr.msra.gmra.mxu1 %v526_v35 }
 0x34e   :  { %v515_v38 = vpop.f32.mrf.mxu1 }
 0x34f   :  { %v516_v43 = vadd.f32 %v891_v42, %v515_v38 }
 0x350   :  { %v960_v39 = vpop.f32.mrf.mxu1 }
 0x351   :  { %v521_v44 = vmax.f32 %v516_v43, 0.0 }
 0x352   :  { %v518_v40 = vpop.f32.mrf.mxu1 }
 0x353   :  { %v644_v45 = vrot.slane %v521_v44, 1 }
 0x354   :  { %v961_v41 = vpop.f32.mrf.mxu1 }
 0x355   :  { %v646_v48 = vsel %vm443_vm9, %v644_v45, 0.0 }
 0x356   :  { %v647_v51 = vsel %vm1296_vm10, 0.0, %v646_v48 }
 0x3c6   :  { %v610_v46 = vpop.f32.mrf.mxu1 }
 0x3c7   :  { %v611_v47 = vadd.f32 %v891_v42, %v610_v46 }
 0x3c8   :  { %v980_v49 = vpop.f32.mrf.mxu1 }
 0x3c9   :  { %v616_v50 = vmax.f32 %v611_v47, 0.0 }
 0x3ca   :  { %v613_v52 = vpop.f32.mrf.mxu1 }
 0x3cb   :  { %v642_v54 = vpack.c.bf16 %v616_v50, %v521_v44  ;;  %v648_v55 = vpack.c.bf16 %v647_v51, %v616_v50 }
 0x3cc   :  { %v981_v56 = vpop.f32.mrf.mxu1 }
 0x3cd   :  { %726 = vrot.lane.b32.xlu0 %v648_v55, %s1087_s2  ;;  %991 = vmatmul.mubr.msk.bf16.vlgmr.msra.gmra.mxu0 %vm236_vm6, %v642_v54 }
 0x3ce   :  { %995 = vmatpush3.bf16.msra.mxu0 %v1067_v53  ;;  %1010 = vmatprep.mubr.msk.bf16.mxu0 %vm1088_vm8, %v1086_v60 }
 0x3cf   :  { %996 = vmatprep.subr.bf16.mxu0 %v1086_v60 }
 0x3d2   :  { %997 = vmatpush3.bf16.msra.mxu0 %v1068_v57 }
 0x3d3   :  { %998 = vmatprep.subr.bf16.mxu0 %v1086_v60 }
 0x3d6   :  { %999 = vmatpush3.bf16.msra.mxu0 %v1069_v58 }
 0x3d7   :  { %1000 = vmatprep.subr.bf16.mxu0 %v1086_v60 }
 0x3da   :  { %1001 = vmatpush3.bf16.msra.mxu0 %v1070_v59 }
 0x3db   :  { %1002 = vmatprep.subr.bf16.mxu0 %v1086_v60 }
 0x3de   :  { %1003 = vmatpush3.bf16.msra.mxu0 %v1071_v61 }
 0x3df   :  { %1004 = vmatprep.subr.bf16.mxu0 %v1086_v60 }
 0x3e2   :  { %1005 = vmatpush3.bf16.msra.mxu0 %v1072_v62 }
 0x3e3   :  { %1006 = vmatprep.subr.bf16.mxu0 %v1086_v60 }
 0x3e6   :  { %1007 = vmatpush3.bf16.msra.mxu0 %v1073_v63 }
 0x3e7   :  { %1008 = vmatprep.subr.bf16.mxu0 %v1086_v60 }
 0x3ea   :  { %1009 = vmatpush3.bf16.msra.mxu0 %v1074_v0 }
 0x43f   :  { %v727_v1 = vpop.permute.xlu0 %726 }
 0x440   :  { %v729_v2 = vsel %vm236_vm6, %v642_v54, %v727_v1 }
 0x441   :  { %1011 = vmatmul.mubr.bf16.vlgmr.msra.gmra.mxu0 %v729_v2 }
 0x48d   :  { %v716_v4 = vpop.f32.mrf.mxu0 }
 0x48e   :  { %v717_v5 = vadd.f32 %v905_v3, %v716_v4 }
 0x48f   :  { %v992_v6 = vpop.f32.mrf.mxu0 }
 0x490   :  { %1075 = vtanh.f32 %v717_v5 }
 0x491   :  { %v719_v7 = vpop.f32.mrf.mxu0 }
 0x492   :  { %v720_v8 = vadd.f32 %v905_v3, %v719_v7 }
 0x493   :  { %v993_v9 = vpop.f32.mrf.mxu0 }
 0x494   :  { %1077 = vtanh.f32 %v720_v8 }
 0x49d   :  { %v1076_v10 = vpop.eup %1075 }
 0x49e   :  { %822 = vst [vmem:[%s1440_s11] sm:$0xff] %v1076_v10  ;;  %v832_v19 = vsub.f32 %v1076_v10, %v826_v17 }
 0x4a0   :  { %v836_v23 = vand.u32 2147483647, %v832_v19 }
 0x4a1   :  { %v1078_v60 = vpop.eup %1077 }
 0x4a2   :  { %824 = vst [vmem:[%s1440_s11 + $0x10] sm:$0xff] %v1078_v60  ;;  %v834_v21 = vsub.f32 %v1078_v60, %v920_v18  ;;  %v840_v29 = vsel %vm120_vm3, %v836_v23, 0.0 }
 0x4a4   :  { %v838_v26 = vand.u32 2147483647, %v834_v21 }
 0x4a6   :  { %v843_v33 = vsel %vm120_vm3, %v838_v26, 0.0 }
 0x501   :  { %v813_v11 = vpop.f32.mrf.mxu0 }
 0x502   :  { %v814_v12 = vadd.f32 %v905_v3, %v813_v11 }
 0x503   :  { %v1012_v13 = vpop.f32.mrf.mxu0 }
 0x504   :  { %1079 = vtanh.f32 %v814_v12 }
 0x505   :  { %v816_v14 = vpop.f32.mrf.mxu0 }
 0x506   :  { %v817_v15 = vadd.f32 %v905_v3, %v816_v14 }
 0x507   :  { %v1013_v16 = vpop.f32.mrf.mxu0 }
 0x508   :  { %1081 = vtanh.f32 %v817_v15 }
 0x511   :  { %v1080_v22 = vpop.eup %1079 }
 0x512   :  { %823 = vst [vmem:[%s1440_s11 + $0x8] sm:$0xff] %v1080_v22  ;;  %v833_v24 = vsub.f32 %v1080_v22, %v919_v20 }
 0x514   :  { %v837_v27 = vand.u32 2147483647, %v833_v24 }
 0x515   :  { %v1082_v28 = vpop.eup %1081 }
 0x516   :  { %v841_v30 = vsel %vm120_vm3, %v837_v27, 0.0  ;;  %825 = vst [vmem:[%s1440_s11 + $0x18] sm:$0xff] %v1082_v28  ;;  %v835_v31 = vsub.f32 %v1082_v28, %v921_v25 }
 0x517   :  { %v842_v32 = vadd.f32 %v841_v30, %v840_v29 }
 0x518   :  { %v839_v34 = vand.u32 2147483647, %v835_v31 }
 0x519   :  { %v844_v35 = vadd.f32 %v843_v33, %v842_v32 }
 0x51a   :  { %v845_v36 = vsel %vm120_vm3, %v839_v34, 0.0 }
 0x51b   :  { %v846_v37 = vadd.f32 %v845_v36, %v844_v35 }
 0x51d   :  { %v847_v38 = vrot.slane %v846_v37, 4 }
 0x51f   :  { %v848_v39 = vadd.f32 %v847_v38, %v846_v37 }
 0x521   :  { %v849_v40 = vrot.slane %v848_v39, 2 }
 0x523   :  { %v850_v41 = vadd.f32 %v849_v40, %v848_v39 }
 0x525   :  { %v851_v42 = vrot.slane %v850_v41, 1 }
 0x527   :  { %v852_v43 = vadd.f32 %v851_v42, %v850_v41 }
 0x529   :  { %v853_v44 = vsel %vm120_vm3, %v852_v43, 0.0 }
 0x52a   :  { %854 = vst [vmem:[%s1441_s12] sm:$0x1] %v853_v44 }

</bundles_post_ra>
